<compile_context>
chip_gen: v5e
topology: v5e:2x2
jax: 0.10.0
libtpu: 0.0.40
codegen_flags: <defaults>
</compile_context>

<pallas_src>
import math
import functools

import jax
import jax.numpy as jnp
from jax import lax
from jax.experimental import pallas as pl
from jax.experimental.pallas import tpu as pltpu


def round_up(n, m):
    return ((n + m - 1) // m) * m


# ----------------------------------------------------------------------------
# Pallas kernels
# ----------------------------------------------------------------------------
def stacked_blocks_kernel(
    x_ref,                                   # (BS, Dp) f32 -- embeddings + PE
    wqkv_ref, bqkv_ref,                      # (1, Dp, 3Dp) bf16, (1, 1, 3Dp) f32
    wo_ref, bo_ref,                          # (1, Dp, Dp) bf16, (1, 1, Dp) f32
    g1_ref, be1_ref,                         # (1, 1, Dp) f32
    wf1_ref, bf1_ref,                        # (1, Dp, Hp) bf16, (1, 1, Hp) f32
    wf2_ref, bf2_ref,                        # (1, Hp, Dp) bf16, (1, 1, Dp) f32
    g2_ref, be2_ref,                         # (1, 1, Dp) f32
    o_ref,                                   # (BS, Dp) f32 -- resident activation
    *, B, S, D, Dp,
):
    l = pl.program_id(0)

    # Layer 0: seed the resident activation slab from the embedded input.
    @pl.when(l == 0)
    def _():
        o_ref[...] = x_ref[...]

    x = o_ref[...]                           # (BS, Dp) f32, padded cols == 0
    x_bf = x.astype(jnp.bfloat16)

    # Mask of "real" (unpadded) feature lanes; stats are over the true D.
    lane_mask = (lax.broadcasted_iota(jnp.int32, (1, Dp), 1) < D).astype(jnp.float32)
    inv_d = 1.0 / D

    # --- single-head self-attention (fused QKV projection) -------------------
    qkv = jnp.dot(x_bf, wqkv_ref[0], preferred_element_type=jnp.float32) + bqkv_ref[0]
    q = qkv[:, 0:Dp] * (1.0 / math.sqrt(D))        # fold 1/sqrt(d) into q
    k = qkv[:, Dp:2 * Dp]
    v = qkv[:, 2 * Dp:3 * Dp]

    q3 = q.reshape(B, S, Dp).astype(jnp.bfloat16)
    k3 = k.reshape(B, S, Dp).astype(jnp.bfloat16)
    v3 = v.reshape(B, S, Dp).astype(jnp.bfloat16)

    # TODO(synk): for realistic S (>=1k), switch to a tiled/online-softmax
    # (flash-style) loop over KV blocks instead of materializing (B,S,S).
    scores = jnp.einsum('bqd,bkd->bqk', q3, k3,
                        preferred_element_type=jnp.float32)
    scores = scores - jnp.max(scores, axis=-1, keepdims=True)
    p = jnp.exp(scores)
    p = p * pl.reciprocal(jnp.sum(p, axis=-1, keepdims=True), approx=True)
    attn3 = jnp.einsum('bqk,bkd->bqd', p.astype(jnp.bfloat16), v3,
                       preferred_element_type=jnp.float32)
    attn = attn3.reshape(B * S, Dp)
    attn = jnp.dot(attn.astype(jnp.bfloat16), wo_ref[0],
                   preferred_element_type=jnp.float32) + bo_ref[0]

    # --- residual + LayerNorm 1 (f32 stats over true D) -----------------------
    h = x + attn
    mu = jnp.sum(h, axis=-1, keepdims=True) * inv_d
    c = (h - mu) * lane_mask
    var = jnp.sum(c * c, axis=-1, keepdims=True) * inv_d
    h = c * lax.rsqrt(var + 1e-5) * g1_ref[0] + be1_ref[0]

    # --- feed-forward ---------------------------------------------------------
    f = jnp.dot(h.astype(jnp.bfloat16), wf1_ref[0],
                preferred_element_type=jnp.float32) + bf1_ref[0]
    f = jnp.maximum(f, 0.0)
    f = jnp.dot(f.astype(jnp.bfloat16), wf2_ref[0],
                preferred_element_type=jnp.float32) + bf2_ref[0]

    # --- residual + LayerNorm 2 ----------------------------------------------
    h2 = h + f
    mu2 = jnp.sum(h2, axis=-1, keepdims=True) * inv_d
    c2 = (h2 - mu2) * lane_mask
    var2 = jnp.sum(c2 * c2, axis=-1, keepdims=True) * inv_d
    o_ref[...] = c2 * lax.rsqrt(var2 + 1e-5) * g2_ref[0] + be2_ref[0]


def output_proj_kernel(x_ref, w_ref, b_ref, o_ref):
    # (tm, Dp) @ (Dp, tn) + (1, tn) -> (tm, tn), f32 accumulation.
    o_ref[...] = (
        jnp.dot(x_ref[...].astype(jnp.bfloat16), w_ref[...],
                preferred_element_type=jnp.float32)
        + b_ref[...]
    )


# ----------------------------------------------------------------------------
# Wrappers calling pallas_call
# ----------------------------------------------------------------------------
def stacked_transformer_blocks(x2d, pp, *, B, S, D):
    BS, Dp = x2d.shape
    L, _, Dp3 = pp["wqkv"].shape
    Hp = pp["wf1"].shape[2]

    kernel = functools.partial(stacked_blocks_kernel, B=B, S=S, D=D, Dp=Dp)

    def wspec(shape):
        nd = len(shape)
        return pl.BlockSpec((1,) + shape, lambda l, _nd=nd: (l,) + (0,) * _nd)

    in_specs = [
        pl.BlockSpec((BS, Dp), lambda l: (0, 0)),        # x (resident, used at l==0)
        wspec((Dp, Dp3)), wspec((1, Dp3)),               # wqkv, bqkv
        wspec((Dp, Dp)), wspec((1, Dp)),                 # wo, bo
        wspec((1, Dp)), wspec((1, Dp)),                  # ln1 gamma/beta
        wspec((Dp, Hp)), wspec((1, Hp)),                 # ffn1
        wspec((Hp, Dp)), wspec((1, Dp)),                 # ffn2
        wspec((1, Dp)), wspec((1, Dp)),                  # ln2 gamma/beta
    ]

    flops = L * (2 * BS * Dp * Dp3            # fused QKV
                 + 2 * B * S * S * Dp         # q @ k^T
                 + 2 * B * S * S * Dp         # p @ v
                 + 2 * BS * Dp * Dp           # output proj of attention
                 + 2 * BS * Dp * Hp           # ffn1
                 + 2 * BS * Hp * Dp)          # ffn2
    transcendentals = L * B * S * S           # exp in softmax
    bytes_accessed = (2 * BS * Dp * 4                                   # x in + out (f32)
                      + L * 2 * (Dp * Dp3 + Dp * Dp + Dp * Hp + Hp * Dp)  # bf16 weights
                      + L * 4 * (Dp3 + 6 * Dp + Hp))                    # f32 biases + LN

    return pl.pallas_call(
        kernel,
        out_shape=jax.ShapeDtypeStruct((BS, Dp), jnp.float32),
        grid=(L,),
        in_specs=in_specs,
        out_specs=pl.BlockSpec((BS, Dp), lambda l: (0, 0)),   # resident across layers
        compiler_params=pltpu.CompilerParams(
            dimension_semantics=("arbitrary",),               # layer l depends on l-1
            vmem_limit_bytes=32 * 1024 * 1024,
        ),
        cost_estimate=pl.CostEstimate(
            flops=flops, transcendentals=transcendentals,
            bytes_accessed=bytes_accessed),
    )(
        x2d,
        pp["wqkv"], pp["bqkv"],
        pp["wo"], pp["bo"],
        pp["g1"], pp["be1"],
        pp["wf1"], pp["bf1"],
        pp["wf2"], pp["bf2"],
        pp["g2"], pp["be2"],
    )


def output_projection(x2d, w, b):
    BS, Dp = x2d.shape
    Vp = w.shape[1]

    tm = min(BS, 256)
    if BS % tm != 0:
        tm = BS
    tn = 128 if Vp % 128 == 0 else Vp
    grid = (BS // tm, Vp // tn)

    flops = 2 * BS * Dp * Vp
    bytes_accessed = BS * Dp * 4 + Dp * Vp * 2 + Vp * 4 + BS * Vp * 4

    return pl.pallas_call(
        output_proj_kernel,
        out_shape=jax.ShapeDtypeStruct((BS, Vp), jnp.float32),
        grid=grid,
        in_specs=[
            pl.BlockSpec((tm, Dp), lambda i, j: (i, 0)),
            pl.BlockSpec((Dp, tn), lambda i, j: (0, j)),
            pl.BlockSpec((1, tn), lambda i, j: (0, j)),
        ],
        out_specs=pl.BlockSpec((tm, tn), lambda i, j: (i, j)),
        compiler_params=pltpu.CompilerParams(
            dimension_semantics=("parallel", "parallel"),
            vmem_limit_bytes=32 * 1024 * 1024,
        ),
        cost_estimate=pl.CostEstimate(
            flops=flops, transcendentals=0, bytes_accessed=bytes_accessed),
    )(x2d, w, b)


# ----------------------------------------------------------------------------
# Parameter init (deterministic, synthetic), padding, and full forward
# ----------------------------------------------------------------------------
def sinusoidal_pe(max_len, d):
    pos = jnp.arange(max_len, dtype=jnp.float32)[:, None]
    div = jnp.exp(jnp.arange(0, d, 2, dtype=jnp.float32) * (-math.log(10000.0) / d))
    pe = jnp.zeros((max_len, d), dtype=jnp.float32)
    pe = pe.at[:, 0::2].set(jnp.sin(pos * div))
    pe = pe.at[:, 1::2].set(jnp.cos(pos * div))
    return pe


def init_params(key, vocab_size, embedding_dim, hidden_dim, num_layers, max_len=128):
    D, H, V = embedding_dim, hidden_dim, vocab_size
    keys = jax.random.split(key, 2 + num_layers)

    def dense(k, shape):
        return 0.02 * jax.random.normal(k, shape, dtype=jnp.float32)

    params = {
        "emb": dense(keys[0], (V, D)),
        "pe": sinusoidal_pe(max_len, D),
        "wout": dense(keys[1], (D, V)),
        "bout": jnp.zeros((1, V), dtype=jnp.float32),
        "layers": [],
    }
    for l in range(num_layers):
        lk = jax.random.split(keys[2 + l], 6)
        params["layers"].append({
            "wq": dense(lk[0], (D, D)), "bq": jnp.zeros((1, D), jnp.float32),
            "wk": dense(lk[1], (D, D)), "bk": jnp.zeros((1, D), jnp.float32),
            "wv": dense(lk[2], (D, D)), "bv": jnp.zeros((1, D), jnp.float32),
            "wo": dense(lk[3], (D, D)), "bo": jnp.zeros((1, D), jnp.float32),
            "g1": jnp.ones((1, D), jnp.float32), "be1": jnp.zeros((1, D), jnp.float32),
            "wf1": dense(lk[4], (D, H)), "bf1": jnp.zeros((1, H), jnp.float32),
            "wf2": dense(lk[5], (H, D)), "bf2": jnp.zeros((1, D), jnp.float32),
            "g2": jnp.ones((1, D), jnp.float32), "be2": jnp.zeros((1, D), jnp.float32),
        })
    return params


def prepare_padded_params(params):
    """Zero-pad D/H/V to multiples of 128 (lane-dense), stack per-layer weights
    along a leading L axis, fuse Q|K|V, and cast matmul weights to bf16."""
    D = params["emb"].shape[1]
    H = params["layers"][0]["wf1"].shape[1]
    V = params["wout"].shape[1]
    Dp, Hp, Vp = round_up(D, 128), round_up(H, 128), round_up(V, 128)

    def padw(w, r, c):
        return jnp.pad(w, ((0, r - w.shape[0]), (0, c - w.shape[1])))

    ls = params["layers"]
    pp = {
        "emb": jnp.pad(params["emb"], ((0, 0), (0, Dp - D))),
        "pe": jnp.pad(params["pe"], ((0, 0), (0, Dp - D))),
        "wqkv": jnp.stack([
            jnp.concatenate([padw(l["wq"], Dp, Dp), padw(l["wk"], Dp, Dp),
                             padw(l["wv"], Dp, Dp)], axis=1) for l in ls
        ]).astype(jnp.bfloat16),
        "bqkv": jnp.stack([
            jnp.concatenate([padw(l["bq"], 1, Dp), padw(l["bk"], 1, Dp),
                             padw(l["bv"], 1, Dp)], axis=1) for l in ls]),
        "wo": jnp.stack([padw(l["wo"], Dp, Dp) for l in ls]).astype(jnp.bfloat16),
        "bo": jnp.stack([padw(l["bo"], 1, Dp) for l in ls]),
        "g1": jnp.stack([padw(l["g1"], 1, Dp) for l in ls]),
        "be1": jnp.stack([padw(l["be1"], 1, Dp) for l in ls]),
        "wf1": jnp.stack([padw(l["wf1"], Dp, Hp) for l in ls]).astype(jnp.bfloat16),
        "bf1": jnp.stack([padw(l["bf1"], 1, Hp) for l in ls]),
        "wf2": jnp.stack([padw(l["wf2"], Hp, Dp) for l in ls]).astype(jnp.bfloat16),
        "bf2": jnp.stack([padw(l["bf2"], 1, Dp) for l in ls]),
        "g2": jnp.stack([padw(l["g2"], 1, Dp) for l in ls]),
        "be2": jnp.stack([padw(l["be2"], 1, Dp) for l in ls]),
        "wout": padw(params["wout"], Dp, Vp).astype(jnp.bfloat16),
        "bout": padw(params["bout"], 1, Vp),
    }
    return pp


@functools.partial(jax.jit, static_argnames=("d_true", "v_true"))
def mini_llm_forward(tokens, pp, *, d_true, v_true):
    B, S = tokens.shape
    Dp = pp["emb"].shape[1]

    # Embedding lookup (glue: gather in plain JAX), padded feature lanes are 0.
    x = pp["emb"][tokens]                              # (B, S, Dp)

    # transpose(0,1) -> add PE over seq -> transpose back  ==  broadcast add.
    x = x + pp["pe"][:S][None, :, :]
    # TODO(synk): PositionalEncoding dropout omitted (inference/eval semantics).

    # Fold batch into the sublane axis: single lane-dense (B*S, Dp) slab.
    x2d = x.reshape(B * S, Dp)
    x2d = stacked_transformer_blocks(x2d, pp, B=B, S=S, D=d_true)

    logits_p = output_projection(x2d, pp["wout"], pp["bout"])   # (B*S, Vp)
    return logits_p[:, :v_true].reshape(B, S, v_true)


if __name__ == "__main__":
    vocab_size, embedding_dim, hidden_dim, num_layers = 64, 32, 64, 2
    batch, seq = 2, 8

    key = jax.random.PRNGKey(0)
    pkey, tkey = jax.random.split(key)
    params = init_params(pkey, vocab_size, embedding_dim, hidden_dim, num_layers)
    padded = prepare_padded_params(params)
    tokens = jax.random.randint(tkey, (batch, seq), 0, vocab_size, dtype=jnp.int32)

    logits = mini_llm_forward(tokens, padded, d_true=embedding_dim, v_true=vocab_size)
    jax.block_until_ready(logits)
    assert logits.shape == (batch, seq, vocab_size)
    assert bool(jnp.all(jnp.isfinite(logits)))
    print("KERNEL_OK")
</pallas_src>

<mosaic_0001>
module attributes {stable_mosaic.version = 11 : i64} {
  func.func @output_proj_kernel(%arg0: i32, %arg1: i32, %arg2: memref<16x128xf32, #tpu.memory_space<vmem>>, %arg3: memref<128x128xbf16, #tpu.memory_space<vmem>>, %arg4: memref<1x128xf32, #tpu.memory_space<vmem>>, %arg5: memref<16x128xf32, #tpu.memory_space<vmem>>) attributes {dimension_semantics = [#tpu.dimension_semantics<parallel>, #tpu.dimension_semantics<parallel>], iteration_bounds = array<i64: 1, 1>, scalar_prefetch = 0 : i64, scratch_operands = 0 : i64, tpu.core_type = #tpu.core_type<tc>, window_params = [{transform_indices = @transform_0, window_bounds = array<i64: 16, 128>}, {transform_indices = @transform_1, window_bounds = array<i64: 128, 128>}, {transform_indices = @transform_2, window_bounds = array<i64: 1, 128>}, {transform_indices = @transform_3, window_bounds = array<i64: 16, 128>}]} {
    %c0 = arith.constant 0 : index
    %c0_0 = arith.constant 0 : index
    %0 = vector.load %arg2[%c0, %c0_0] : memref<16x128xf32, #tpu.memory_space<vmem>>, vector<16x128xf32>
    %1 = arith.truncf %0 : vector<16x128xf32> to vector<16x128xbf16>
    %c0_1 = arith.constant 0 : index
    %c0_2 = arith.constant 0 : index
    %2 = vector.load %arg3[%c0_1, %c0_2] : memref<128x128xbf16, #tpu.memory_space<vmem>>, vector<128x128xbf16>
    %cst = arith.constant dense<0.000000e+00> : vector<16x128xf32>
    %3 = tpu.matmul %1, %2, %cst {dimension_numbers = #tpu.dot_dimension_numbers<[1], [0], [0], [1], [0, 0, 1, 1], [], []>} : vector<16x128xbf16>, vector<128x128xbf16>, vector<16x128xf32> -> vector<16x128xf32>
    %c0_3 = arith.constant 0 : index
    %c0_4 = arith.constant 0 : index
    %4 = vector.load %arg4[%c0_3, %c0_4] : memref<1x128xf32, #tpu.memory_space<vmem>>, vector<1x128xf32>
    %5 = vector.broadcast %4 : vector<1x128xf32> to vector<16x128xf32>
    %6 = arith.addf %3, %5 : vector<16x128xf32>
    %c0_5 = arith.constant 0 : index
    %c0_6 = arith.constant 0 : index
    %7 = vector.load %arg5[%c0_5, %c0_6] : memref<16x128xf32, #tpu.memory_space<vmem>>, vector<16x128xf32>
    tpu.vector_store %arg5[%c0_5, %c0_6], %6 {strides = array<i32>} : memref<16x128xf32, #tpu.memory_space<vmem>>, vector<16x128xf32>,
    return
  }
  func.func @transform_0(%arg0: i32, %arg1: i32) -> (i32, i32) {
    %c0_i32 = arith.constant 0 : i32
    %c0_i32_0 = arith.constant 0 : i32
    return %arg0, %c0_i32 : i32, i32
  }
  func.func @transform_1(%arg0: i32, %arg1: i32) -> (i32, i32) {
    %c0_i32 = arith.constant 0 : i32
    %c0_i32_0 = arith.constant 0 : i32
    return %c0_i32, %arg1 : i32, i32
  }
  func.func @transform_2(%arg0: i32, %arg1: i32) -> (i32, i32) {
    %c0_i32 = arith.constant 0 : i32
    %c0_i32_0 = arith.constant 0 : i32
    return %c0_i32, %arg1 : i32, i32
  }
  func.func @transform_3(%arg0: i32, %arg1: i32) -> (i32, i32) {
    %c0_i32 = arith.constant 0 : i32
    return %arg0, %arg1 : i32, i32
  }
}

module attributes {stable_mosaic.version = 11 : i64} {
  func.func @stacked_blocks_kernel(%arg0: i32, %arg1: memref<16x128xf32, #tpu.memory_space<vmem>>, %arg2: memref<1x128x384xbf16, #tpu.memory_space<vmem>>, %arg3: memref<1x1x384xf32, #tpu.memory_space<vmem>>, %arg4: memref<1x128x128xbf16, #tpu.memory_space<vmem>>, %arg5: memref<1x1x128xf32, #tpu.memory_space<vmem>>, %arg6: memref<1x1x128xf32, #tpu.memory_space<vmem>>, %arg7: memref<1x1x128xf32, #tpu.memory_space<vmem>>, %arg8: memref<1x128x128xbf16, #tpu.memory_space<vmem>>, %arg9: memref<1x1x128xf32, #tpu.memory_space<vmem>>, %arg10: memref<1x128x128xbf16, #tpu.memory_space<vmem>>, %arg11: memref<1x1x128xf32, #tpu.memory_space<vmem>>, %arg12: memref<1x1x128xf32, #tpu.memory_space<vmem>>, %arg13: memref<1x1x128xf32, #tpu.memory_space<vmem>>, %arg14: memref<16x128xf32, #tpu.memory_space<vmem>>) attributes {dimension_semantics = [#tpu.dimension_semantics<arbitrary>], iteration_bounds = array<i64: 2>, scalar_prefetch = 0 : i64, scratch_operands = 0 : i64, tpu.core_type = #tpu.core_type<tc>, window_params = [{pipeline_mode = #tpu.pipeline_mode<synchronous>, transform_indices = @transform_0, window_bounds = array<i64: 16, 128>}, {transform_indices = @transform_1, window_bounds = array<i64: 1, 128, 384>}, {transform_indices = @transform_2, window_bounds = array<i64: 1, 1, 384>}, {transform_indices = @transform_3, window_bounds = array<i64: 1, 128, 128>}, {transform_indices = @transform_4, window_bounds = array<i64: 1, 1, 128>}, {transform_indices = @transform_5, window_bounds = array<i64: 1, 1, 128>}, {transform_indices = @transform_6, window_bounds = array<i64: 1, 1, 128>}, {transform_indices = @transform_7, window_bounds = array<i64: 1, 128, 128>}, {transform_indices = @transform_8, window_bounds = array<i64: 1, 1, 128>}, {transform_indices = @transform_9, window_bounds = array<i64: 1, 128, 128>}, {transform_indices = @transform_10, window_bounds = array<i64: 1, 1, 128>}, {transform_indices = @transform_11, window_bounds = array<i64: 1, 1, 128>}, {transform_indices = @transform_12, window_bounds = array<i64: 1, 1, 128>}, {pipeline_mode = #tpu.pipeline_mode<synchronous>, transform_indices = @transform_13, window_bounds = array<i64: 16, 128>}]} {
    %c0_i32 = arith.constant 0 : i32
    %0 = arith.cmpi eq, %arg0, %c0_i32 : i32
    %1 = arith.extui %0 : i1 to i32
    %c0_i32_0 = arith.constant 0 : i32
    %2 = arith.cmpi ne, %1, %c0_i32_0 : i32
    scf.if %2 {
      %c0_59 = arith.constant 0 : index
      %c0_60 = arith.constant 0 : index
      %123 = vector.load %arg1[%c0_59, %c0_60] : memref<16x128xf32, #tpu.memory_space<vmem>>, vector<16x128xf32>
      %c0_61 = arith.constant 0 : index
      %c0_62 = arith.constant 0 : index
      %124 = vector.load %arg14[%c0_61, %c0_62] : memref<16x128xf32, #tpu.memory_space<vmem>>, vector<16x128xf32>
      tpu.vector_store %arg14[%c0_61, %c0_62], %123 {strides = array<i32>} : memref<16x128xf32, #tpu.memory_space<vmem>>, vector<16x128xf32>,
    } else {
    }
    %c0 = arith.constant 0 : index
    %c0_1 = arith.constant 0 : index
    %3 = vector.load %arg14[%c0, %c0_1] : memref<16x128xf32, #tpu.memory_space<vmem>>, vector<16x128xf32>
    %4 = arith.truncf %3 : vector<16x128xf32> to vector<16x128xbf16>
    %5 = tpu.iota {dimensions = array<i32: 1>} : vector<1x128xi32>
    %c32_i32 = arith.constant 32 : i32
    %6 = vector.broadcast %c32_i32 : i32 to vector<1x128xi32>
    %7 = arith.cmpi slt, %5, %6 : vector<1x128xi32>
    %8 = arith.extui %7 : vector<1x128xi1> to vector<1x128xi32>
    %9 = arith.sitofp %8 : vector<1x128xi32> to vector<1x128xf32>
    %c0_2 = arith.constant 0 : index
    %c0_3 = arith.constant 0 : index
    %c0_4 = arith.constant 0 : index
    %10 = vector.load %arg2[%c0_2, %c0_3, %c0_4] : memref<1x128x384xbf16, #tpu.memory_space<vmem>>, vector<1x128x384xbf16>
    %11 = vector.shape_cast %10 : vector<1x128x384xbf16> to vector<128x384xbf16>
    %cst = arith.constant dense<0.000000e+00> : vector<16x384xf32>
    %12 = tpu.matmul %4, %11, %cst {dimension_numbers = #tpu.dot_dimension_numbers<[1], [0], [0], [1], [0, 0, 1, 1], [], []>} : vector<16x128xbf16>, vector<128x384xbf16>, vector<16x384xf32> -> vector<16x384xf32>
    %c0_5 = arith.constant 0 : index
    %c0_6 = arith.constant 0 : index
    %c0_7 = arith.constant 0 : index
    %13 = vector.load %arg3[%c0_5, %c0_6, %c0_7] : memref<1x1x384xf32, #tpu.memory_space<vmem>>, vector<1x1x384xf32>
    %14 = vector.shape_cast %13 : vector<1x1x384xf32> to vector<1x384xf32>
    %15 = vector.broadcast %14 : vector<1x384xf32> to vector<16x384xf32>
    %16 = arith.addf %12, %15 : vector<16x384xf32>
    %17 = vector.extract_strided_slice %16 {offsets = [0, 0], sizes = [16, 128], strides = [1, 1]} : vector<16x384xf32> to vector<16x128xf32>
    %cst_8 = arith.constant 0.176776692 : f32
    %18 = vector.broadcast %cst_8 : f32 to vector<16x128xf32>
    %19 = arith.mulf %17, %18 : vector<16x128xf32>
    %20 = vector.extract_strided_slice %16 {offsets = [0, 128], sizes = [16, 128], strides = [1, 1]} : vector<16x384xf32> to vector<16x128xf32>
    %21 = vector.extract_strided_slice %16 {offsets = [0, 256], sizes = [16, 128], strides = [1, 1]} : vector<16x384xf32> to vector<16x128xf32>
    %22 = vector.shape_cast %19 : vector<16x128xf32> to vector<2x8x128xf32>
    %23 = arith.truncf %22 : vector<2x8x128xf32> to vector<2x8x128xbf16>
    %24 = vector.shape_cast %20 : vector<16x128xf32> to vector<2x8x128xf32>
    %25 = arith.truncf %24 : vector<2x8x128xf32> to vector<2x8x128xbf16>
    %26 = vector.shape_cast %21 : vector<16x128xf32> to vector<2x8x128xf32>
    %27 = arith.truncf %26 : vector<2x8x128xf32> to vector<2x8x128xbf16>
    "tpu.trace_start"() <{level = 10 : i32, message = "bqd,bkd->bqk"}> : () -> ()
    %cst_9 = arith.constant dense<0.000000e+00> : vector<2x8x8xf32>
    %28 = tpu.matmul %23, %25, %cst_9 {dimension_numbers = #tpu.dot_dimension_numbers<[2], [2], [1], [1], [0, 0, 0, 1, 1, 1], [0], [0]>} : vector<2x8x128xbf16>, vector<2x8x128xbf16>, vector<2x8x8xf32> -> vector<2x8x8xf32>
    "tpu.trace_stop"() : () -> ()
    %cst_10 = arith.constant dense<0xFF800000> : vector<2x8xf32>
    %29 = vector.multi_reduction <maximumf>, %28, %cst_10 [2] : vector<2x8x8xf32> to vector<2x8xf32>
    %30 = vector.shape_cast %29 : vector<2x8xf32> to vector<2x8x1xf32>
    %31 = vector.broadcast %30 : vector<2x8x1xf32> to vector<2x8x8xf32>
    %32 = arith.subf %28, %31 : vector<2x8x8xf32>
    %33 = math.exp %32 : vector<2x8x8xf32>
    %cst_11 = arith.constant dense<0.000000e+00> : vector<2x8xf32>
    %34 = vector.multi_reduction <add>, %33, %cst_11 [2] : vector<2x8x8xf32> to vector<2x8xf32>
    %35 = vector.shape_cast %34 : vector<2x8xf32> to vector<2x8x1xf32>
    %36 = tpu.reciprocal %35 {approx = true} : vector<2x8x1xf32> -> vector<2x8x1xf32>
    %37 = vector.broadcast %36 : vector<2x8x1xf32> to vector<2x8x8xf32>
    %38 = arith.mulf %33, %37 : vector<2x8x8xf32>
    %39 = arith.truncf %38 : vector<2x8x8xf32> to vector<2x8x8xbf16>
    "tpu.trace_start"() <{level = 10 : i32, message = "bqk,bkd->bqd"}> : () -> ()
    %cst_12 = arith.constant dense<0.000000e+00> : vector<2x8x128xf32>
    %40 = tpu.matmul %39, %27, %cst_12 {dimension_numbers = #tpu.dot_dimension_numbers<[2], [1], [1], [2], [0, 0, 0, 1, 1, 2], [0], [0]>} : vector<2x8x8xbf16>, vector<2x8x128xbf16>, vector<2x8x128xf32> -> vector<2x8x128xf32>
    "tpu.trace_stop"() : () -> ()
    %41 = vector.shape_cast %40 : vector<2x8x128xf32> to vector<16x128xf32>
    %42 = arith.truncf %41 : vector<16x128xf32> to vector<16x128xbf16>
    %c0_13 = arith.constant 0 : index
    %c0_14 = arith.constant 0 : index
    %c0_15 = arith.constant 0 : index
    %43 = vector.load %arg4[%c0_13, %c0_14, %c0_15] : memref<1x128x128xbf16, #tpu.memory_space<vmem>>, vector<1x128x128xbf16>
    %44 = vector.shape_cast %43 : vector<1x128x128xbf16> to vector<128x128xbf16>
    %cst_16 = arith.constant dense<0.000000e+00> : vector<16x128xf32>
    %45 = tpu.matmul %42, %44, %cst_16 {dimension_numbers = #tpu.dot_dimension_numbers<[1], [0], [0], [1], [0, 0, 1, 1], [], []>} : vector<16x128xbf16>, vector<128x128xbf16>, vector<16x128xf32> -> vector<16x128xf32>
    %c0_17 = arith.constant 0 : index
    %c0_18 = arith.constant 0 : index
    %c0_19 = arith.constant 0 : index
    %46 = vector.load %arg5[%c0_17, %c0_18, %c0_19] : memref<1x1x128xf32, #tpu.memory_space<vmem>>, vector<1x1x128xf32>
    %47 = vector.shape_cast %46 : vector<1x1x128xf32> to vector<1x128xf32>
    %48 = vector.broadcast %47 : vector<1x128xf32> to vector<16x128xf32>
    %49 = arith.addf %45, %48 : vector<16x128xf32>
    %50 = arith.addf %3, %49 : vector<16x128xf32>
    %cst_20 = arith.constant dense<0.000000e+00> : vector<16xf32>
    %51 = vector.multi_reduction <add>, %50, %cst_20 [1] : vector<16x128xf32> to vector<16xf32>
    %52 = vector.shape_cast %51 : vector<16xf32> to vector<16x1xf32>
    %cst_21 = arith.constant 3.125000e-02 : f32
    %53 = vector.broadcast %cst_21 : f32 to vector<16x1xf32>
    %54 = arith.mulf %52, %53 : vector<16x1xf32>
    %55 = vector.broadcast %54 : vector<16x1xf32> to vector<16x128xf32>
    %56 = arith.subf %50, %55 : vector<16x128xf32>
    %57 = vector.broadcast %9 : vector<1x128xf32> to vector<16x128xf32>
    %58 = arith.mulf %56, %57 : vector<16x128xf32>
    %59 = arith.mulf %58, %58 : vector<16x128xf32>
    %cst_22 = arith.constant dense<0.000000e+00> : vector<16xf32>
    %60 = vector.multi_reduction <add>, %59, %cst_22 [1] : vector<16x128xf32> to vector<16xf32>
    %61 = vector.shape_cast %60 : vector<16xf32> to vector<16x1xf32>
    %cst_23 = arith.constant 3.125000e-02 : f32
    %62 = vector.broadcast %cst_23 : f32 to vector<16x1xf32>
    %63 = arith.mulf %61, %62 : vector<16x1xf32>
    %cst_24 = arith.constant 9.99999974E-6 : f32
    %64 = vector.broadcast %cst_24 : f32 to vector<16x1xf32>
    %65 = arith.addf %63, %64 : vector<16x1xf32>
    %66 = math.rsqrt %65 : vector<16x1xf32>
    %67 = vector.broadcast %66 : vector<16x1xf32> to vector<16x128xf32>
    %68 = arith.mulf %58, %67 : vector<16x128xf32>
    %c0_25 = arith.constant 0 : index
    %c0_26 = arith.constant 0 : index
    %c0_27 = arith.constant 0 : index
    %69 = vector.load %arg6[%c0_25, %c0_26, %c0_27] : memref<1x1x128xf32, #tpu.memory_space<vmem>>, vector<1x1x128xf32>
    %70 = vector.shape_cast %69 : vector<1x1x128xf32> to vector<1x128xf32>
    %71 = vector.broadcast %70 : vector<1x128xf32> to vector<16x128xf32>
    %72 = arith.mulf %68, %71 : vector<16x128xf32>
    %c0_28 = arith.constant 0 : index
    %c0_29 = arith.constant 0 : index
    %c0_30 = arith.constant 0 : index
    %73 = vector.load %arg7[%c0_28, %c0_29, %c0_30] : memref<1x1x128xf32, #tpu.memory_space<vmem>>, vector<1x1x128xf32>
    %74 = vector.shape_cast %73 : vector<1x1x128xf32> to vector<1x128xf32>
    %75 = vector.broadcast %74 : vector<1x128xf32> to vector<16x128xf32>
    %76 = arith.addf %72, %75 : vector<16x128xf32>
    %77 = arith.truncf %76 : vector<16x128xf32> to vector<16x128xbf16>
    %c0_31 = arith.constant 0 : index
    %c0_32 = arith.constant 0 : index
    %c0_33 = arith.constant 0 : index
    %78 = vector.load %arg8[%c0_31, %c0_32, %c0_33] : memref<1x128x128xbf16, #tpu.memory_space<vmem>>, vector<1x128x128xbf16>
    %79 = vector.shape_cast %78 : vector<1x128x128xbf16> to vector<128x128xbf16>
    %cst_34 = arith.constant dense<0.000000e+00> : vector<16x128xf32>
    %80 = tpu.matmul %77, %79, %cst_34 {dimension_numbers = #tpu.dot_dimension_numbers<[1], [0], [0], [1], [0, 0, 1, 1], [], []>} : vector<16x128xbf16>, vector<128x128xbf16>, vector<16x128xf32> -> vector<16x128xf32>
    %c0_35 = arith.constant 0 : index
    %c0_36 = arith.constant 0 : index
    %c0_37 = arith.constant 0 : index
    %81 = vector.load %arg9[%c0_35, %c0_36, %c0_37] : memref<1x1x128xf32, #tpu.memory_space<vmem>>, vector<1x1x128xf32>
    %82 = vector.shape_cast %81 : vector<1x1x128xf32> to vector<1x128xf32>
    %83 = vector.broadcast %82 : vector<1x128xf32> to vector<16x128xf32>
    %84 = arith.addf %80, %83 : vector<16x128xf32>
    %cst_38 = arith.constant 0.000000e+00 : f32
    %85 = vector.broadcast %cst_38 : f32 to vector<16x128xf32>
    %86 = arith.maximumf %84, %85 : vector<16x128xf32>
    %87 = arith.truncf %86 : vector<16x128xf32> to vector<16x128xbf16>
    %c0_39 = arith.constant 0 : index
    %c0_40 = arith.constant 0 : index
    %c0_41 = arith.constant 0 : index
    %88 = vector.load %arg10[%c0_39, %c0_40, %c0_41] : memref<1x128x128xbf16, #tpu.memory_space<vmem>>, vector<1x128x128xbf16>
    %89 = vector.shape_cast %88 : vector<1x128x128xbf16> to vector<128x128xbf16>
    %cst_42 = arith.constant dense<0.000000e+00> : vector<16x128xf32>
    %90 = tpu.matmul %87, %89, %cst_42 {dimension_numbers = #tpu.dot_dimension_numbers<[1], [0], [0], [1], [0, 0, 1, 1], [], []>} : vector<16x128xbf16>, vector<128x128xbf16>, vector<16x128xf32> -> vector<16x128xf32>
    %c0_43 = arith.constant 0 : index
    %c0_44 = arith.constant 0 : index
    %c0_45 = arith.constant 0 : index
    %91 = vector.load %arg11[%c0_43, %c0_44, %c0_45] : memref<1x1x128xf32, #tpu.memory_space<vmem>>, vector<1x1x128xf32>
    %92 = vector.shape_cast %91 : vector<1x1x128xf32> to vector<1x128xf32>
    %93 = vector.broadcast %92 : vector<1x128xf32> to vector<16x128xf32>
    %94 = arith.addf %90, %93 : vector<16x128xf32>
    %95 = arith.addf %76, %94 : vector<16x128xf32>
    %cst_46 = arith.constant dense<0.000000e+00> : vector<16xf32>
    %96 = vector.multi_reduction <add>, %95, %cst_46 [1] : vector<16x128xf32> to vector<16xf32>
    %97 = vector.shape_cast %96 : vector<16xf32> to vector<16x1xf32>
    %cst_47 = arith.constant 3.125000e-02 : f32
    %98 = vector.broadcast %cst_47 : f32 to vector<16x1xf32>
    %99 = arith.mulf %97, %98 : vector<16x1xf32>
    %100 = vector.broadcast %99 : vector<16x1xf32> to vector<16x128xf32>
    %101 = arith.subf %95, %100 : vector<16x128xf32>
    %102 = vector.broadcast %9 : vector<1x128xf32> to vector<16x128xf32>
    %103 = arith.mulf %101, %102 : vector<16x128xf32>
    %104 = arith.mulf %103, %103 : vector<16x128xf32>
    %cst_48 = arith.constant dense<0.000000e+00> : vector<16xf32>
    %105 = vector.multi_reduction <add>, %104, %cst_48 [1] : vector<16x128xf32> to vector<16xf32>
    %106 = vector.shape_cast %105 : vector<16xf32> to vector<16x1xf32>
    %cst_49 = arith.constant 3.125000e-02 : f32
    %107 = vector.broadcast %cst_49 : f32 to vector<16x1xf32>
    %108 = arith.mulf %106, %107 : vector<16x1xf32>
    %cst_50 = arith.constant 9.99999974E-6 : f32
    %109 = vector.broadcast %cst_50 : f32 to vector<16x1xf32>
    %110 = arith.addf %108, %109 : vector<16x1xf32>
    %111 = math.rsqrt %110 : vector<16x1xf32>
    %112 = vector.broadcast %111 : vector<16x1xf32> to vector<16x128xf32>
    %113 = arith.mulf %103, %112 : vector<16x128xf32>
    %c0_51 = arith.constant 0 : index
    %c0_52 = arith.constant 0 : index
    %c0_53 = arith.constant 0 : index
    %114 = vector.load %arg12[%c0_51, %c0_52, %c0_53] : memref<1x1x128xf32, #tpu.memory_space<vmem>>, vector<1x1x128xf32>
    %115 = vector.shape_cast %114 : vector<1x1x128xf32> to vector<1x128xf32>
    %116 = vector.broadcast %115 : vector<1x128xf32> to vector<16x128xf32>
    %117 = arith.mulf %113, %116 : vector<16x128xf32>
    %c0_54 = arith.constant 0 : index
    %c0_55 = arith.constant 0 : index
    %c0_56 = arith.constant 0 : index
    %118 = vector.load %arg13[%c0_54, %c0_55, %c0_56] : memref<1x1x128xf32, #tpu.memory_space<vmem>>, vector<1x1x128xf32>
    %119 = vector.shape_cast %118 : vector<1x1x128xf32> to vector<1x128xf32>
    %120 = vector.broadcast %119 : vector<1x128xf32> to vector<16x128xf32>
    %121 = arith.addf %117, %120 : vector<16x128xf32>
    %c0_57 = arith.constant 0 : index
    %c0_58 = arith.constant 0 : index
    %122 = vector.load %arg14[%c0_57, %c0_58] : memref<16x128xf32, #tpu.memory_space<vmem>>, vector<16x128xf32>
    tpu.vector_store %arg14[%c0_57, %c0_58], %121 {strides = array<i32>} : memref<16x128xf32, #tpu.memory_space<vmem>>, vector<16x128xf32>,
    return
  }
  func.func @transform_0(%arg0: i32) -> (i32, i32) {
    %c0_i32 = arith.constant 0 : i32
    %c0_i32_0 = arith.constant 0 : i32
    %c0_i32_1 = arith.constant 0 : i32
    return %c0_i32, %c0_i32_0 : i32, i32
  }
  func.func @transform_1(%arg0: i32) -> (i32, i32, i32) {
    %c0_i32 = arith.constant 0 : i32
    %c0_i32_0 = arith.constant 0 : i32
    %c0_i32_1 = arith.constant 0 : i32
    return %arg0, %c0_i32, %c0_i32_0 : i32, i32, i32
  }
  func.func @transform_2(%arg0: i32) -> (i32, i32, i32) {
    %c0_i32 = arith.constant 0 : i32
    %c0_i32_0 = arith.constant 0 : i32
    %c0_i32_1 = arith.constant 0 : i32
    return %arg0, %c0_i32, %c0_i32_0 : i32, i32, i32
  }
  func.func @transform_3(%arg0: i32) -> (i32, i32, i32) {
    %c0_i32 = arith.constant 0 : i32
    %c0_i32_0 = arith.constant 0 : i32
    %c0_i32_1 = arith.constant 0 : i32
    return %arg0, %c0_i32, %c0_i32_0 : i32, i32, i32
  }
  func.func @transform_4(%arg0: i32) -> (i32, i32, i32) {
    %c0_i32 = arith.constant 0 : i32
    %c0_i32_0 = arith.constant 0 : i32
    %c0_i32_1 = arith.constant 0 : i32
    return %arg0, %c0_i32, %c0_i32_0 : i32, i32, i32
  }
  func.func @transform_5(%arg0: i32) -> (i32, i32, i32) {
    %c0_i32 = arith.constant 0 : i32
    %c0_i32_0 = arith.constant 0 : i32
    %c0_i32_1 = arith.constant 0 : i32
    return %arg0, %c0_i32, %c0_i32_0 : i32, i32, i32
  }
  func.func @transform_6(%arg0: i32) -> (i32, i32, i32) {
    %c0_i32 = arith.constant 0 : i32
    %c0_i32_0 = arith.constant 0 : i32
    %c0_i32_1 = arith.constant 0 : i32
    return %arg0, %c0_i32, %c0_i32_0 : i32, i32, i32
  }
  func.func @transform_7(%arg0: i32) -> (i32, i32, i32) {
    %c0_i32 = arith.constant 0 : i32
    %c0_i32_0 = arith.constant 0 : i32
    %c0_i32_1 = arith.constant 0 : i32
    return %arg0, %c0_i32, %c0_i32_0 : i32, i32, i32
  }
  func.func @transform_8(%arg0: i32) -> (i32, i32, i32) {
    %c0_i32 = arith.constant 0 : i32
    %c0_i32_0 = arith.constant 0 : i32
    %c0_i32_1 = arith.constant 0 : i32
    return %arg0, %c0_i32, %c0_i32_0 : i32, i32, i32
  }
  func.func @transform_9(%arg0: i32) -> (i32, i32, i32) {
    %c0_i32 = arith.constant 0 : i32
    %c0_i32_0 = arith.constant 0 : i32
    %c0_i32_1 = arith.constant 0 : i32
    return %arg0, %c0_i32, %c0_i32_0 : i32, i32, i32
  }
  func.func @transform_10(%arg0: i32) -> (i32, i32, i32) {
    %c0_i32 = arith.constant 0 : i32
    %c0_i32_0 = arith.constant 0 : i32
    %c0_i32_1 = arith.constant 0 : i32
    return %arg0, %c0_i32, %c0_i32_0 : i32, i32, i32
  }
  func.func @transform_11(%arg0: i32) -> (i32, i32, i32) {
    %c0_i32 = arith.constant 0 : i32
    %c0_i32_0 = arith.constant 0 : i32
    %c0_i32_1 = arith.constant 0 : i32
    return %arg0, %c0_i32, %c0_i32_0 : i32, i32, i32
  }
  func.func @transform_12(%arg0: i32) -> (i32, i32, i32) {
    %c0_i32 = arith.constant 0 : i32
    %c0_i32_0 = arith.constant 0 : i32
    %c0_i32_1 = arith.constant 0 : i32
    return %arg0, %c0_i32, %c0_i32_0 : i32, i32, i32
  }
  func.func @transform_13(%arg0: i32) -> (i32, i32) {
    %c0_i32 = arith.constant 0 : i32
    %c0_i32_0 = arith.constant 0 : i32
    %c0_i32_1 = arith.constant 0 : i32
    return %c0_i32, %c0_i32_0 : i32, i32
  }
}

</mosaic_0001>

<bundles_post_ra>
// kernel: mini_llm_forward.3
= control target key start
LH: loop header
LB: loop body
LE: loop exit
PB: predicated region body
PF: predicated region fallthrough
CT: control target
= control target key end

     0   :  { %s205_s1 = inlined_call_operand.vmem [shape: bf16[128,128], index: 1, kind: input, shape index: {}]   ;;  %s206_s2 = inlined_call_operand.vmem [shape: f32[1,128], index: 2, kind: input, shape index: {}]   ;;  %s207_s0 = inlined_call_operand.vmem [shape: f32[16,128], index: 0, kind: input, shape index: {}]   ;;  %s208_s3 = inlined_call_operand.vmem [shape: f32[16,128], index: 3, kind: output, shape index: {}]  }
   0x1   :  { %v144_v0 = vld [vmem:[%s205_s1 + $0x38] sm:$0xff]  ;;  %v143_v1 = vld [vmem:[%s205_s1 + $0x30] sm:$0xff]  ;;  %v142_v2 = vld [vmem:[%s205_s1 + $0x28] sm:$0xff] }
   0x2   :  { %85 = vmatpush.bf16.msra.mxu0 %v144_v0  ;;  %v141_v3 = vld [vmem:[%s205_s1 + $0x20] sm:$0xff]  ;;  %v140_v4 = vld [vmem:[%s205_s1 + $0x18] sm:$0xff]  ;;  %v139_v5 = vld [vmem:[%s205_s1 + $0x10] sm:$0xff] }
   0x3   :  { %v138_v6 = vld [vmem:[%s205_s1 + $0x8] sm:$0xff]  ;;  %v137_v7 = vld [vmem:[%s205_s1] sm:$0xff] }
   0x4   :  { %v14_v8 = vld [vmem:[%s207_s0] sm:$0xff]  ;;  %v15_v9 = vld [vmem:[%s207_s0 + $0x8] sm:$0xff] }
   0x5   :  { %v16_v10 = vpack.c.bf16 %v15_v9, %v14_v8  ;;  %v145_v11 = vld [vmem:[%s206_s2] ss:$0 sm:$0xff] }
   0x6   :  { %86 = vmatpush.bf16.msra.mxu0 %v143_v1 }
   0xa   :  { %87 = vmatpush.bf16.msra.mxu0 %v142_v2 }
   0xe   :  { %88 = vmatpush.bf16.msra.mxu0 %v141_v3 }
  0x12   :  { %89 = vmatpush.bf16.msra.mxu0 %v140_v4 }
  0x16   :  { %90 = vmatpush.bf16.msra.mxu0 %v139_v5 }
  0x1a   :  { %91 = vmatpush.bf16.msra.mxu0 %v138_v6 }
  0x1e   :  { %92 = vmatpush.bf16.msra.mxu0 %v137_v7 }
  0x21   :  { %93 = vmatmul.bf16.vlgmr.msra.gmra.mxu0 %v16_v10 }
  0x9e   :  { %v94_v12 = vpop.f32.mrf.mxu0 }
  0x9f   :  { %v95_v13 = vadd.f32 %v145_v11, %v94_v12 }
  0xa1   :  { %99 = vst [vmem:[%s208_s3] sm:$0xff] %v95_v13 }
  0xa6   :  { %v96_v14 = vpop.f32.mrf.mxu0 }
  0xa7   :  { %v97_v15 = vadd.f32 %v145_v11, %v96_v14 }
  0xa9   :  { %100 = vst [vmem:[%s208_s3 + $0x8] sm:$0xff] %v97_v15 }

// kernel: mini_llm_forward.2
= control target key start
LH: loop header
LB: loop body
LE: loop exit
PB: predicated region body
PF: predicated region fallthrough
CT: control target
= control target key end

     0   :  { %s2435_s0 = inlined_call_operand.vmem [shape: f32[16,128], index: 0, kind: input, shape index: {}]   ;;  %s2436_s1 = inlined_call_operand.hbm [shape: bf16[2,128,384], index: 1, kind: input, shape index: {}]   ;;  %s2437_s2 = inlined_call_operand.vmem [shape: f32[2,1,384], index: 2, kind: input, shape index: {}]   ;;  %s2438_s3 = inlined_call_operand.vmem [shape: bf16[2,128,128], index: 3, kind: input, shape index: {}]   ;;  %s2439_s4 = inlined_call_operand.vmem [shape: f32[2,1,128], index: 4, kind: input, shape index: {}]   ;;  %s2440_s5 = inlined_call_operand.vmem [shape: f32[2,1,128], index: 5, kind: input, shape index: {}]   ;;  %s2441_s6 = inlined_call_operand.vmem [shape: f32[2,1,128], index: 6, kind: input, shape index: {}]   ;;  %s2442_s7 = inlined_call_operand.hbm [shape: bf16[2,128,128], index: 7, kind: input, shape index: {}]   ;;  %s2443_s8 = inlined_call_operand.vmem [shape: f32[2,1,128], index: 8, kind: input, shape index: {}]   ;;  %s2444_s9 = inlined_call_operand.hbm [shape: bf16[2,128,128], index: 9, kind: input, shape index: {}]   ;;  %s2445_s10 = inlined_call_operand.vmem [shape: f32[2,1,128], index: 10, kind: input, shape index: {}]   ;;  %s2446_s11 = inlined_call_operand.vmem [shape: f32[2,1,128], index: 11, kind: input, shape index: {}]   ;;  %s2447_s12 = inlined_call_operand.vmem [shape: f32[2,1,128], index: 12, kind: input, shape index: {}]   ;;  %s2448_s13 = inlined_call_operand.vmem [shape: f32[16,128], index: 13, kind: output, shape index: {}]  }
   0x1   :  { %2458 = sst [smem:[#allocation12_spill]] %s2435_s0 }
   0x2   :  { %2459 = sst [smem:[#allocation13_spill]] %s2436_s1 }
   0x3   :  { %2460 = sst [smem:[#allocation14_spill]] %s2437_s2 }
   0x4   :  { %2461 = sst [smem:[#allocation15_spill]] %s2438_s3 }
   0x5   :  { %2462 = sst [smem:[#allocation16_spill]] %s2442_s7 }
   0x6   :  { %2463 = sst [smem:[#allocation17_spill]] %s2444_s9 }
   0x7   :  { %2464 = sst [smem:[#allocation18_spill]] %s2445_s10 }
   0x8   :  { %2465 = sst [smem:[#allocation19_spill]] %s2446_s11 }
   0x9   :  { %2466 = sst [smem:[#allocation20_spill]] %s2447_s12 }
   0xa   :  { %2467 = sst [smem:[#allocation21_spill]] %s2448_s13 }
   0xb   :  { %18 = vsyncpa [#allocation3], 0 }
   0xc   :  { %20 = vsyncpa [#allocation3 + $0x1], 0 }
   0xd   :  { %21 = vsyncpa [#allocation5], 0 }
   0xe   :  { %23 = vsyncpa [#allocation5 + $0x1], 0  ;;  %s2073_s25 = smov 0   ;;  %s2075_s26 = smov 0  }
   0xf   :  { %s2077_s27 = smov 0   ;;  %s2079_s28 = smov 0  }
  0x10 LB: > { %2468 = sst [smem:[#allocation9_spill]] %s1992_s27  ;;  %s2092_s29 = sadd.s32 4294967295, %s1996_s28   ;;  %s1996_s28 = sphi %s2079_s28, %s2493_s28   ;;  %s1992_s27 = sphi %s2077_s27, %s2495_s27   ;;  %s1988_s26 = sphi %s2075_s26, %s2497_s26   ;;  %s1984_s25 = sphi %s2073_s25, %s2496_s25  }
  0x11   : > { %s2095_s30 = sadd.s32 1, %s1996_s28   ;;  %s57_s15 = sadd.s32 1, %s1992_s27 }
  0x12   : > { %2469 = sst [smem:[#allocation10_spill]] %s2095_s30  ;;  %s54_s14 = ssub.s32 %s1996_s28, %s2095_s30 }
  0x13   : > { %p55_p0 = scmp.eq.s32.totalorder %s54_s14, 0  ;;  %p64_p1 = scmp.ne.s32.totalorder %s1992_s27, %s1988_s26 }
  0x14   : > { %p65_p2 = scmp.eq.s32.totalorder %s1996_s28, 0  ;;  %p70_p3 = scmp.ne.s32.totalorder %s1988_s26, %s1984_s25 }
  0x15   : > { %s2105_s16 = scalar_select %p55_p0, %s1992_s27, %s57_s15  }
  0x16   : > { %p66_p4 = por %p65_p2, %p64_p1  ;;  %p71_p5 = scmp.eq.s32.totalorder %s2092_s29, 0 }
  0x17   : > { %2470 = sst [smem:[#allocation11_spill]] %s2105_s16  ;;  %p1807_p6 = scmp.lt.s32.totalorder %s1996_s28, 2 }
  0x18   : > { %p2109_p7 = por %p71_p5, %p70_p3  ;;  %s2114_s18 = sand.u32 1, %s1992_s27  }
  0x19   : > { %p2116_p8 = pnand %p1807_p6, %p66_p4  ;;  %s459_s20 = sand.u32 1, %s1996_s28  }
  0x1a   : > { %s2454_s21 = sshll.u32 %s2114_s18, 6  ;;  %s1736_s22 = sshll.u32 %s1996_s28, 6 }
  0x1b   : > { %s463_s23 = scalar_lea.vmem [#allocation4], %s2454_s21  ;;  %s2473_s7 = sld [smem:[#allocation16_spill]] }
  0x1c   : > { %s471_s24 = sshll.u32 %s463_s23, 4  ;;  %s2128_s27 = scalar_lea.sflag [#allocation5], %s459_s20  ;;  %s472_s24 = int_to_ptr.vmem [resolvable:$true] %s471_s24 }
  0x1d   : > { %p1872_p10 = pneg %p2116_p8 }
  0x21   : > { %s468_s15 = scalar_lea.hbm %s2473_s7, %s1736_s22  ;;  %s1875_s25 = scalar_lea.hbm %s2473_s7, 128 }
  0x22   : > { %s469_s16 = sshll.u32 %s468_s15, 4  ;;  %s470_s16 = int_to_ptr.hbm [resolvable:$true] %s469_s16 }
  0x23   : > { %s1868_s30 = sshra.s32 %s470_s16, 4  ;;  %s1869_s30 = int_to_ptr.hbm [resolvable:$true] %s1868_s30 }
  0x24   : > { %s1870_s13 = scalar_lea.hbm %s1869_s30, 64  ;;  %p1876_p13 = scmp.lt.s32.totalorder %s1869_s30, %s2473_s7 }
  0x25   : > { %p1871_p9 = scmp.ne.s32.totalorder %s1869_s30, %s1870_s13  ;;  %p1877_p0 = scmp.lt.s32.totalorder %s1875_s25, %s1870_s13 }
  0x27   : > { %p1873_p11 = pnand %p1872_p10, %p1871_p9  ;;  %p1878_p1 = por %p1877_p0, %p1876_p13 }
  0x29   : > { %p1874_p12 = pneg %p1873_p11 }
  0x2b   : > { %p1879_p2 = pnand %p1878_p1, %p1874_p12 }
  0x2d   : > { %1882 = shalt.err (!%p1879_p2)
}
  0x2e   : > { %s2456_s20 = smov 64   ;;  %s2457_s15 = smov 4  }
  0x2f   : > { %1803 = dma.hbm_to_vmem [thread:$0]  (!%p2116_p8), %s470_s16, 1024, %s472_s24, %s2128_s27, %s2456_s20, %s2456_s20, %s2457_s15  }
  0x30   : > { %s2474_s9 = sld [smem:[#allocation17_spill]]  ;;  %s2475_s23 = sshll.u32 %s2114_s18, 6 }
  0x31   : > { %s491_s25 = scalar_lea.vmem [#allocation6], %s2475_s23  ;;  %p1533_p3 = scmp.ge.s32.totalorder %s1996_s28, 1 }
  0x32   : > { %s499_s14 = sshll.u32 %s491_s25, 4  ;;  %p525_p4 = scmp.lt.s32.totalorder %s1996_s28, 3  ;;  %s2154_s14 = int_to_ptr.vmem [resolvable:$true] %s499_s14 }
  0x33   : > { %s1787_s7 = smul.u32 192, %s2114_s18  ;;  %s2477_s1 = sld [smem:[#allocation13_spill]] }
  0x34   : > { %p2159_p5 = pnand %p1533_p3, %p525_p4  ;;  %s1788_s16 = smul.u32 192, %s1996_s28 }
  0x35   : > { %s408_s30 = scalar_lea.vmem [#allocation2], %s1787_s7  ;;  %s405_s25 = scalar_lea.sflag [#allocation3], %s2114_s18 }
  0x36   : > { %s496_s13 = scalar_lea.hbm %s2474_s9, %s1736_s22 }
  0x37   : > { %s497_s21 = sshll.u32 %s496_s13, 4  ;;  %s416_s13 = sshll.u32 %s408_s30, 4  ;;  %s2152_s21 = int_to_ptr.hbm [resolvable:$true] %s497_s21  ;;  %s417_s13 = int_to_ptr.vmem [resolvable:$true] %s416_s13 }
  0x39   : > { %s413_s0 = scalar_lea.hbm %s2477_s1, %s1788_s16  ;;  %s1905_s10 = scalar_lea.hbm %s2477_s1, 384 }
  0x3a   : > { %s414_s23 = sshll.u32 %s413_s0, 4  ;;  %s415_s23 = int_to_ptr.hbm [resolvable:$true] %s414_s23 }
  0x3b   : > { %s1898_s20 = sshra.s32 %s415_s23, 4  ;;  %s1899_s20 = int_to_ptr.hbm [resolvable:$true] %s1898_s20 }
  0x3c   : > { %s1900_s15 = scalar_lea.hbm %s1899_s20, 192  ;;  %p1906_p12 = scmp.lt.s32.totalorder %s1899_s20, %s2477_s1 }
  0x3d   : > { %p1901_p6 = scmp.ne.s32.totalorder %s1899_s20, %s1900_s15  ;;  %p1907_p13 = scmp.lt.s32.totalorder %s1905_s10, %s1900_s15 }
  0x3f   : > { %p1903_p9 = pnand %p1901_p6, %p1872_p10  ;;  %p1908_p0 = por %p1907_p13, %p1906_p12 }
  0x41   : > { %p1904_p11 = pneg %p1903_p9 }
  0x43   : > { %p1909_p1 = pnand %p1908_p0, %p1904_p11 }
  0x45   : > { %1912 = shalt.err (!%p1909_p1)
}
  0x46   : > { %s2000_s7 = smov 192   ;;  %s2001_s18 = smov 12  }
  0x47   : > { %1800 = dma.hbm_to_vmem [thread:$0]  (!%p2116_p8), %s415_s23, 3072, %s417_s13, %s405_s25, %s2000_s7, %s2000_s7, %s2001_s18  }
  0x48   : > { %s1928_s22 = sshra.s32 %s2152_s21, 4  ;;  %s1935_s20 = scalar_lea.hbm %s2474_s9, 128  ;;  %s1929_s22 = int_to_ptr.hbm [resolvable:$true] %s1928_s22 }
  0x49   : > { %s1930_s0 = scalar_lea.hbm %s1929_s22, 64  ;;  %p1936_p6 = scmp.lt.s32.totalorder %s1929_s22, %s2474_s9 }
  0x4a   : > { %p1931_p2 = scmp.ne.s32.totalorder %s1929_s22, %s1930_s0  ;;  %p1937_p9 = scmp.lt.s32.totalorder %s1935_s20, %s1930_s0 }
  0x4c   : > { %p1933_p3 = pnand %p1931_p2, %p1872_p10  ;;  %p1938_p11 = por %p1937_p9, %p1936_p6 }
  0x4e   : > { %p1934_p4 = pneg %p1933_p3 }
  0x50   : > { %p1939_p12 = pnand %p1938_p11, %p1934_p4 }
  0x52   : > { %1942 = shalt.err (!%p1939_p12)
}
  0x53   : > { %s2478_s13 = smov 4   ;;  %s2479_s23 = smov 64  }
  0x54   : > { %1806 = dma.hbm_to_vmem [thread:$0]  (!%p2116_p8), %s2152_s21, 1024, %s2154_s14, %s2128_s27, %s2479_s23, %s2479_s23, %s2478_s13  }
  0x55   : > { %529 = sbr.rel (%p2159_p5) target bundleno = 1775 (0x6ef), region = 72  ;;  %s531_s25 = sand.u32 (!%p2159_p5), 1, %s1988_s26  }
  0x56   : > { %s1789_s28 = smul.u32 (!%p2159_p5), 192, %s531_s25  ;;  %s532_s24 = scalar_lea.sflag (!%p2159_p5), [#allocation3], %s531_s25 }
  0x58   : > { %s2200_s16 = scalar_lea.vmem (!%p2159_p5), [#allocation2], %s1789_s28 }
  0x5a   : > { %1975 = dma.done.wait (%p2109_p7), %s532_s24, 3072  }
  0x5b   : > { %1977 = vsyncadd (%p2109_p7), %s532_s24, 4294964224  ;;  %s541_s19 = sand.u32 1, %s2092_s29   ;;  %s1534_s7 = sshll.u32 %s531_s25, 6 }
  0x5c   : > { %s542_s27 = scalar_lea.sflag [#allocation5], %s541_s19  ;;  %s2207_s21 = scalar_lea.vmem [#allocation4], %s1534_s7 }
  0x5d   : > { %1979 = dma.done.wait (%p2109_p7), %s542_s27, 2048  }
  0x5e   : > { %1981 = vsyncadd (%p2109_p7), %s542_s27, 4294965248  ;;  %p634_p8 = scmp.lt.s32.totalorder %s2092_s29, 1  ;;  %s2480_s3 = sld [smem:[#allocation15_spill]] }
  0x5f   : > { %s2481_s2 = sld [smem:[#allocation14_spill]]  ;;  %s2257_s28 = scalar_lea.vmem [#allocation6], %s1534_s7 }
  0x60   : > { %s2215_s12 = scalar_select %p634_p8, %s2092_s29, 1 }
  0x61   : > { %s2482_s10 = sld [smem:[#allocation18_spill]]  ;;  %p1538_p7 = scmp.ne.s32.totalorder %s2092_s29, 0 }
  0x62   : > { %s1790_s14 = smul.u32 3, %s2215_s12  ;;  %s1738_s18 = sshll.u32 %s2215_s12, 6 }
  0x63   : > { %s651_s27 = scalar_lea.vmem %s2441_s6, %s2215_s12  ;;  %s654_s0 = scalar_lea.vmem %s2443_s8, %s2215_s12 }
  0x64   : > { %s2222_s17 = scalar_lea.vmem %s2480_s3, %s1738_s18  ;;  %s2484_s23 = sld [smem:[#allocation20_spill]] }
  0x65   : > { %s2231_s13 = scalar_lea.vmem %s2481_s2, %s1790_s14  ;;  %s2483_s14 = sld [smem:[#allocation19_spill]] }
  0x66   : > { %s2485_s22 = sld [smem:[#allocation12_spill]] (!%p1538_p7) }
  0x67   : > { %s657_s20 = scalar_lea.vmem %s2482_s10, %s2215_s12  ;;  %668 = sbr.rel (%p1538_p7) target bundleno = 112 (0x70), region = 88 }
  0x68   : > { %s2486_s10 = sld [smem:[#allocation21_spill]] (!%p1538_p7) }
  0x6a   : > { %s663_s25 = scalar_lea.vmem %s2484_s23, %s2215_s12 }
  0x6b   : > { %s660_s30 = scalar_lea.vmem %s2483_s14, %s2215_s12 }
  0x6c   : > { %v669_v0 = vld [vmem:[%s2485_s22] sm:$0xff]  ;;  %v670_v1 = vld [vmem:[%s2485_s22 + $0x8] sm:$0xff] }
  0x6e   : > { %671 = vst [vmem:[%s2486_s10] sm:$0xff] %v669_v0 }
  0x6f   : > { %672 = vst [vmem:[%s2486_s10 + $0x8] sm:$0xff] %v670_v1 }
  0x70 PF: > { %v1626_v2 = vld [vmem:[%s2200_s16 + $0xa8] sm:$0xf]  ;;  %v1761_v3 = vld [vmem:[%s2200_s16 + $0xb0] sm:$0xf0]  ;;  %v1760_v4 = vld [vmem:[%s2200_s16 + $0xac] sm:$0xf]  ;;  %s2488_s24 = scalar_lea.vmem %s2439_s4, %s2215_s12  ;;  %s2489_s19 = scalar_lea.vmem %s2440_s5, %s2215_s12 }
  0x71   : > { %v1627_v5 = vor.u32 %v1761_v3, %v1626_v2  ;;  %v1628_v6 = vld [vmem:[%s2200_s16 + $0xb4] sm:$0xf0]  ;;  %v1614_v7 = vld [vmem:[%s2200_s16 + $0x90] sm:$0xf]  ;;  %v1758_v8 = vld [vmem:[%s2200_s16 + $0x98] sm:$0xf0] }
  0x72   : > { %v1631_v9 = vor.u32 %v1760_v4, %v1628_v6  ;;  %v1757_v10 = vld [vmem:[%s2200_s16 + $0x94] sm:$0xf]  ;;  %v1616_v11 = vld [vmem:[%s2200_s16 + $0x9c] sm:$0xf0]  ;;  %v1615_v12 = vor.u32 %v1758_v8, %v1614_v7  ;;  %v1602_v14 = vld [vmem:[%s2200_s16 + $0x78] sm:$0xf] }
  0x73   : > { %849 = vmatpush.bf16.msra.mxu0 %v1627_v5  ;;  %v1619_v13 = vor.u32 %v1757_v10, %v1616_v11  ;;  %v1755_v15 = vld [vmem:[%s2200_s16 + $0x80] sm:$0xf0]  ;;  %v1754_v16 = vld [vmem:[%s2200_s16 + $0x7c] sm:$0xf]  ;;  %v1604_v17 = vld [vmem:[%s2200_s16 + $0x84] sm:$0xf0] }
  0x74   : > { %863 = vmatpush.bf16.msra.mxu1 %v1631_v9  ;;  %v1603_v18 = vor.u32 %v1755_v15, %v1602_v14  ;;  %v1607_v19 = vor.u32 %v1754_v16, %v1604_v17  ;;  %v1590_v20 = vld [vmem:[%s2200_s16 + $0x60] sm:$0xf]  ;;  %v1752_v21 = vld [vmem:[%s2200_s16 + $0x68] sm:$0xf0]  ;;  %v1751_v22 = vld [vmem:[%s2200_s16 + $0x64] sm:$0xf] }
  0x75   : > { %v1592_v23 = vld [vmem:[%s2200_s16 + $0x6c] sm:$0xf0]  ;;  %v1578_v24 = vld [vmem:[%s2200_s16 + $0x48] sm:$0xf]  ;;  %v1591_v25 = vor.u32 %v1752_v21, %v1590_v20  ;;  %v1749_v26 = vld [vmem:[%s2200_s16 + $0x50] sm:$0xf0] }
  0x76   : > { %v1748_v27 = vld [vmem:[%s2200_s16 + $0x4c] sm:$0xf]  ;;  %v1595_v28 = vor.u32 %v1751_v22, %v1592_v23  ;;  %v1580_v29 = vld [vmem:[%s2200_s16 + $0x54] sm:$0xf0]  ;;  %v1579_v30 = vor.u32 %v1749_v26, %v1578_v24  ;;  %v1566_v32 = vld [vmem:[%s2200_s16 + $0x30] sm:$0xf] }
  0x77   : > { %850 = vmatpush.bf16.msra.mxu0 %v1615_v12  ;;  %v1583_v31 = vor.u32 %v1748_v27, %v1580_v29  ;;  %v1746_v33 = vld [vmem:[%s2200_s16 + $0x38] sm:$0xf0]  ;;  %v1745_v34 = vld [vmem:[%s2200_s16 + $0x34] sm:$0xf]  ;;  %v1568_v35 = vld [vmem:[%s2200_s16 + $0x3c] sm:$0xf0] }
  0x78   : > { %864 = vmatpush.bf16.msra.mxu1 %v1619_v13  ;;  %v1567_v36 = vor.u32 %v1746_v33, %v1566_v32  ;;  %v1571_v37 = vor.u32 %v1745_v34, %v1568_v35  ;;  %v1554_v38 = vld [vmem:[%s2200_s16 + $0x18] sm:$0xf]  ;;  %v1743_v39 = vld [vmem:[%s2200_s16 + $0x20] sm:$0xf0]  ;;  %v1742_v40 = vld [vmem:[%s2200_s16 + $0x1c] sm:$0xf] }
  0x79   : > { %v1556_v41 = vld [vmem:[%s2200_s16 + $0x24] sm:$0xf0]  ;;  %v1555_v42 = vor.u32 %v1743_v39, %v1554_v38  ;;  %v1542_v44 = vld [vmem:[%s2200_s16] sm:$0xf]  ;;  %v1740_v45 = vld [vmem:[%s2200_s16 + $0x8] sm:$0xf0] }
  0x7a   : > { %v1559_v43 = vor.u32 %v1742_v40, %v1556_v41  ;;  %v1739_v46 = vld [vmem:[%s2200_s16 + $0x4] sm:$0xf]  ;;  %v1544_v47 = vld [vmem:[%s2200_s16 + $0xc] sm:$0xf0]  ;;  %v1543_v48 = vor.u32 %v1740_v45, %v1542_v44  ;;  %s2487_s7 = sld [smem:[#allocation21_spill]]  ;;  %vm925_vm0 = vcmask 64512  }
  0x7b   : > { %851 = vmatpush.bf16.msra.mxu0 %v1603_v18  ;;  %v1547_v51 = vor.u32 %v1739_v46, %v1544_v47  ;;  %v2321_v53 = vld [vmem:[%s2231_s13] sm:$0x7]  ;;  %v1634_v6 = vld [vmem:[%s2200_s16 + $0xb0] sm:$0xf]  ;;  %v1762_v7 = vld [vmem:[%s2200_s16 + $0xb8] sm:$0xf0] }
  0x7c   : > { %865 = vmatpush.bf16.msra.mxu1 %v1607_v19  ;;  %v715_v54 = vperm.slane %v2321_v53, 0  ;;  %v716_v55 = vperm.slane %v2321_v53, 1  ;;  %v1622_v8 = vld [vmem:[%s2200_s16 + $0x98] sm:$0xf]  ;;  %v1635_v9 = vor.u32 %v1762_v7, %v1634_v6  ;;  %v1759_v10 = vld [vmem:[%s2200_s16 + $0xa0] sm:$0xf0] }
  0x7d   : > { %v1623_v11 = vor.u32 %v1759_v10, %v1622_v8  ;;  %v1610_v12 = vld [vmem:[%s2200_s16 + $0x80] sm:$0xf]  ;;  %v1756_v13 = vld [vmem:[%s2200_s16 + $0x88] sm:$0xf0]  ;;  %v1598_v15 = vld [vmem:[%s2200_s16 + $0x68] sm:$0xf] }
  0x7e   : > { %877 = vmatpush.bf16.msra.mxu2 %v1635_v9  ;;  %v1611_v14 = vor.u32 %v1756_v13, %v1610_v12  ;;  %v1753_v16 = vld [vmem:[%s2200_s16 + $0x70] sm:$0xf0]  ;;  %v1586_v20 = vld [vmem:[%s2200_s16 + $0x50] sm:$0xf]  ;;  %v1750_v21 = vld [vmem:[%s2200_s16 + $0x58] sm:$0xf0] }
  0x7f   : > { %852 = vmatpush.bf16.msra.mxu0 %v1591_v25  ;;  %v1599_v19 = vor.u32 %v1753_v16, %v1598_v15  ;;  %v1587_v22 = vor.u32 %v1750_v21, %v1586_v20  ;;  %v1574_v23 = vld [vmem:[%s2200_s16 + $0x38] sm:$0xf]  ;;  %v1747_v24 = vld [vmem:[%s2200_s16 + $0x40] sm:$0xf0]  ;;  %v1562_v27 = vld [vmem:[%s2200_s16 + $0x20] sm:$0xf]  ;;  %v676_v21 = vlaneseq }
  0x80   : > { %866 = vmatpush.bf16.msra.mxu1 %v1595_v28  ;;  %v2307_v49 = vld [vmem:[%s2487_s7] sm:$0xff]  ;;  %v2312_v50 = vld [vmem:[%s2487_s7 + $0x8] sm:$0xff]  ;;  %v1575_v26 = vor.u32 %v1747_v24, %v1574_v23  ;;  %v1741_v32 = vld [vmem:[%s2200_s16 + $0x10] sm:$0xf0]  ;;  %v717_v47 = vperm.slane %v2321_v53, 2  ;;  %vm953_vm1 = vcmask 1043456  }
  0x81   : > { %v2316_v52 = vpack.c.bf16 %v2312_v50, %v2307_v49  ;;  %v1744_v28 = vld [vmem:[%s2200_s16 + $0x28] sm:$0xf0]  ;;  %v1767_v53 = vld [vmem:[%s2222_s17 + $0x20] sm:$0xff]  ;;  %v1765_v6 = vld [vmem:[%s2222_s17 + $0x10] sm:$0xff] }
  0x82   : > { %878 = vmatpush.bf16.msra.mxu2 %v1623_v11  ;;  %v1563_v29 = vor.u32 %v1744_v28, %v1562_v27  ;;  %v1764_v7 = vld [vmem:[%s2222_s17 + $0x8] sm:$0xff]  ;;  %v1763_v8 = vld [vmem:[%s2222_s17] sm:$0xff] }
  0x83   : > { %853 = vmatpush.bf16.msra.mxu0 %v1579_v30 }
  0x84   : > { %867 = vmatpush.bf16.msra.mxu1 %v1583_v31  ;;  %v1550_v31 = vld [vmem:[%s2200_s16 + $0x8] sm:$0xf] }
  0x85   : > { %v1551_v34 = vor.u32 %v1741_v32, %v1550_v31 }
  0x86   : > { %879 = vmatpush.bf16.msra.mxu2 %v1611_v14  ;;  %v1845_v14 = vld [vmem:[%s2488_s24] ss:$0 sm:$0xff] }
  0x87   : > { %854 = vmatpush.bf16.msra.mxu0 %v1567_v36 }
  0x88   : > { %868 = vmatpush.bf16.msra.mxu1 %v1571_v37 }
  0x8a   : > { %880 = vmatpush.bf16.msra.mxu2 %v1599_v19 }
  0x8b   : > { %855 = vmatpush.bf16.msra.mxu0 %v1555_v42 }
  0x8c   : > { %869 = vmatpush.bf16.msra.mxu1 %v1559_v43 }
  0x8e   : > { %881 = vmatpush.bf16.msra.mxu2 %v1587_v22  ;;  %v677_v22 = vand.u32 127, %v676_v21 }
  0x8f   : > { %856 = vmatpush.bf16.msra.mxu0 %v1543_v48 }
  0x90   : > { %870 = vmatpush.bf16.msra.mxu1 %v1547_v51  ;;  %vm678_vm2 = vcmp.lt.s32.totalorder %v677_v22, 32 }
  0x92   : > { %857 = vmatmul.bf16.vlgmr.msra.gmra.mxu0 %v2316_v52  ;;  %882 = vmatpush.bf16.msra.mxu2 %v1575_v26 }
  0x93   : > { %871 = vmatmul.bf16.vlgmr.msra.gmra.mxu1 %v2316_v52 }
  0x96   : > { %883 = vmatpush.bf16.msra.mxu2 %v1563_v29 }
  0x9a   : > { %884 = vmatpush.bf16.msra.mxu2 %v1551_v34  ;;  %v1777_v34 = vld [vmem:[%s2207_s21 + $0x30] sm:$0xff] }
  0x9d   : > { %885 = vmatmul.bf16.vlgmr.msra.gmra.mxu2 %v2316_v52 }
 0x10f   : > { %v858_v56 = vpop.f32.mrf.mxu0 }
 0x110   : > { %v859_v57 = vadd.f32 %v858_v56, %v715_v54  ;;  %v872_v58 = vpop.f32.mrf.mxu1 }
 0x111   : > { %v873_v59 = vadd.f32 %v872_v58, %v716_v55  ;;  %v1770_v58 = vld [vmem:[%s2222_s17 + $0x38] sm:$0xff] }
 0x112   : > { %v891_v61 = vmul.f32 0.17677669, %v859_v57  ;;  %1058 = vmatpush.bf16.msrb.mxu1 %v1770_v58 }
 0x113   : > { %v895_v60 = vpack.c.bf16 %v873_v59, %v873_v59  ;;  %v1769_v59 = vld [vmem:[%s2222_s17 + $0x30] sm:$0xff] }
 0x114   : > { %v893_v63 = vpack.c.bf16 %v891_v61, %v891_v61  ;;  %v1768_v61 = vld [vmem:[%s2222_s17 + $0x28] sm:$0xff] }
 0x115   : > { %906 = vmatpush.bf16.xpose.msrb.mxu0 %v895_v60 }
 0x116   : > { %1059 = vmatpush.bf16.msrb.mxu1 %v1769_v59 }
 0x117   : > { %v860_v62 = vpop.f32.mrf.mxu0 }
 0x118   : > { %v874_v0 = vpop.f32.mrf.mxu1  ;;  %v861_v2 = vadd.f32 %v860_v62, %v715_v54 }
 0x119   : > { %v875_v1 = vadd.f32 %v874_v0, %v716_v55  ;;  %v1766_v0 = vld [vmem:[%s2222_s17 + $0x18] sm:$0xff] }
 0x11a   : > { %v892_v4 = vmul.f32 0.17677669, %v861_v2  ;;  %1060 = vmatpush.bf16.msrb.mxu1 %v1768_v61 }
 0x11b   : > { %v896_v3 = vpack.c.bf16 %v875_v1, %v875_v1 }
 0x11c   : > { %907 = vmatmul.bf16.vlgmr.msrb.gmra.mxu0 %v893_v63  ;;  %v894_v5 = vpack.c.bf16 %v892_v4, %v892_v4 }
 0x11d   : > { %919 = vmatpush.bf16.xpose.msra.mxu3 %v896_v3 }
 0x11e   : > { %1061 = vmatpush.bf16.msrb.mxu1 %v1767_v53 }
 0x120   : > { %v886_v46 = vpop.f32.mrf.mxu2 }
 0x121   : > { %v887_v51 = vadd.f32 %v886_v46, %v717_v47 }
 0x122   : > { %1062 = vmatpush.bf16.msrb.mxu1 %v1766_v0 }
 0x123   : > { %v897_v54 = vpack.c.bf16 %v887_v51, %v887_v51 }
 0x124   : > { %920 = vmatmul.bf16.vlgmr.msra.gmra.mxu3 %v894_v5 }
 0x125   : > { %v955_v56 = vsel %vm953_vm1, %v897_v54, 0  ;;  %v1784_v54 = vld [vmem:[%s2257_s28 + $0x28] sm:$0xff] }
 0x126   : > { %964 = vmatpush.bf16.msrb.mxu3 %v955_v56  ;;  %1063 = vmatpush.bf16.msrb.mxu1 %v1765_v6 }
 0x128   : > { %v888_v48 = vpop.f32.mrf.mxu2 }
 0x129   : > { %v889_v52 = vadd.f32 %v888_v48, %v717_v47  ;;  %v1785_v47 = vld [vmem:[%s2257_s28 + $0x30] sm:$0xff] }
 0x12a   : > { %1064 = vmatpush.bf16.msrb.mxu1 %v1764_v7  ;;  %v1847_v7 = vld [vmem:[%s651_s27] ss:$0 sm:$0xff] }
 0x12b   : > { %v898_v55 = vpack.c.bf16 %v889_v52, %v889_v52 }
 0x12d   : > { %v974_v57 = vsel %vm953_vm1, %v898_v55, 0 }
 0x12e   : > { %983 = vmatpush.bf16.msra.mxu0 %v974_v57  ;;  %1065 = vmatpush.bf16.msrb.mxu1 %v1763_v8  ;;  %v1783_v57 = vld [vmem:[%s2257_s28 + $0x20] sm:$0xff] }
 0x199   : > { %v908_v17 = vpop.f32.mrf.mxu0 }
 0x19a   : > { %v926_v18 = vsel %vm925_vm0, %v908_v17, -inf }
 0x19b   : > { %927 = vmax.xlane.f32.xlu0 %v926_v18 }
 0x1a1   : > { %v910_v25 = vpop.f32.mrf.mxu0 }
 0x1a2   : > { %v2002_v25 = vmov 0.0  }
 0x1a3   : > { %v2364_v26 = vsel %vm678_vm2, 1.0, %v2002_v25 }
 0x1a7   : > { %v921_v30 = vpop.f32.mrf.mxu3 }
 0x1a8   : > { %v929_v33 = vsel %vm925_vm0, %v921_v30, -inf }
 0x1a9   : > { %930 = vmax.xlane.f32.xlu0 %v929_v33  ;;  %v1778_v33 = vld [vmem:[%s2207_s21 + $0x38] sm:$0xff] }
 0x1aa   : > { %1197 = vmatpush.bf16.msrb.mxu2 %v1778_v33 }
 0x1ae   : > { %1198 = vmatpush.bf16.msrb.mxu2 %v1777_v34 }
 0x1af   : > { %v923_v35 = vpop.f32.mrf.mxu3 }
 0x1b0   : > { %v1776_v35 = vld [vmem:[%s2207_s21 + $0x28] sm:$0xff] }
 0x1b2   : > { %1199 = vmatpush.bf16.msrb.mxu2 %v1776_v35 }
 0x20e   : > { %v928_v36 = vpop.xlane.xlu0 %927 }
 0x20f   : > { %v932_v37 = vsub.f32 %v908_v17, %v928_v36  ;;  %v1775_v36 = vld [vmem:[%s2207_s21 + $0x20] sm:$0xff] }
 0x210   : > { %1200 = vmatpush.bf16.msrb.mxu2 %v1775_v36 }
 0x211   : > { %v934_v38 = vmul.f32 1.442695, %v932_v37  ;;  %v1774_v37 = vld [vmem:[%s2207_s21 + $0x18] sm:$0xff] }
 0x213   : > { %1852 = vpow2.f32 %v934_v38  ;;  %v1773_v38 = vld [vmem:[%s2207_s21 + $0x10] sm:$0xff] }
 0x214   : > { %1201 = vmatpush.bf16.msrb.mxu2 %v1774_v37 }
 0x218   : > { %1202 = vmatpush.bf16.msrb.mxu2 %v1773_v38 }
 0x219   : > { %v1853_v39 = vpop.eup %1852 }
 0x21a   : > { %v938_v40 = vsel %vm925_vm0, %v1853_v39, 0.0 }
 0x21b   : > { %939 = vadd.xlane.f32.xlu1 %v938_v40 }
 0x21c   : > { %v931_v41 = vpop.xlane.xlu0 %930 }
 0x21d   : > { %v933_v42 = vsub.f32 %v921_v30, %v931_v41  ;;  %v1771_v41 = vld [vmem:[%s2207_s21] sm:$0xff] }
 0x21f   : > { %v936_v43 = vmul.f32 1.442695, %v933_v42 }
 0x221   : > { %1854 = vpow2.f32 %v936_v43 }
 0x227   : > { %v1855_v44 = vpop.eup %1854 }
 0x228   : > { %v941_v45 = vsel %vm925_vm0, %v1855_v44, 0.0 }
 0x229   : > { %942 = vadd.xlane.f32.xlu1 %v941_v45 }
 0x28e   : > { %v940_v60 = vpop.xlane.xlu1 %939 }
 0x28f   : > { %1856 = vrcp.f32 %v940_v60 }
 0x295   : > { %v1857_v62 = vpop.eup %1856 }
 0x296   : > { %v946_v63 = vmul.f32 %v1857_v62, %v1853_v39  ;;  %v1772_v39 = vld [vmem:[%s2207_s21 + $0x8] sm:$0xff] }
 0x297   : > { %1203 = vmatpush.bf16.msrb.mxu2 %v1772_v39 }
 0x298   : > { %v948_v1 = vpack.c.bf16 %v946_v63, %v946_v63 }
 0x29a   : > { %1636 = vmatmul.msk.bf16.vlgmr.msrb.gmra.mxu3 %vm925_vm0, %v948_v1 }
 0x29b   : > { %1204 = vmatpush.bf16.msrb.mxu2 %v1771_v41 }
 0x29c   : > { %v943_v2 = vpop.xlane.xlu1 %942 }
 0x29d   : > { %1858 = vrcp.f32 %v943_v2  ;;  %v1846_v2 = vld [vmem:[%s2489_s19] ss:$0 sm:$0xff] }
 0x2a3   : > { %v1859_v3 = vpop.eup %1858 }
 0x2a4   : > { %v947_v4 = vmul.f32 %v1859_v3, %v1855_v44  ;;  %v1786_v44 = vld [vmem:[%s2257_s28 + $0x38] sm:$0xff] }
 0x2a5   : > { %1282 = vmatpush.bf16.msra.mxu3 %v1786_v44 }
 0x2a6   : > { %v949_v5 = vpack.c.bf16 %v947_v4, %v947_v4 }
 0x2a8   : > { %1637 = vmatmul.msk.bf16.vlgmr.msra.gmra.mxu0 %vm925_vm0, %v949_v5 }
 0x2a9   : > { %1283 = vmatpush.bf16.msra.mxu3 %v1785_v47 }
 0x2ad   : > { %1284 = vmatpush.bf16.msra.mxu3 %v1784_v54 }
 0x2b1   : > { %1285 = vmatpush.bf16.msra.mxu3 %v1783_v57 }
 0x31d   : > { %v966_v9 = vpop.f32.mrf.mxu3 }
 0x325   : > { %v968_v10 = vpop.f32.mrf.mxu3  ;;  %v985_v11 = vpop.f32.mrf.mxu0 }
 0x326   : > { %v989_v12 = vpack.c.bf16 %v985_v11, %v966_v9 }
 0x328   : > { %1066 = vmatmul.bf16.vlgmr.msrb.gmra.mxu1 %v989_v12  ;;  %v1782_v12 = vld [vmem:[%s2257_s28 + $0x18] sm:$0xff] }
 0x329   : > { %1286 = vmatpush.bf16.msra.mxu3 %v1782_v12 }
 0x32d   : > { %v987_v13 = vpop.f32.mrf.mxu0 }
 0x32e   : > { %v1781_v13 = vld [vmem:[%s2257_s28 + $0x10] sm:$0xff] }
 0x32f   : > { %1287 = vmatpush.bf16.msra.mxu3 %v1781_v13 }
 0x3a5   : > { %v1067_v15 = vpop.f32.mrf.mxu1 }
 0x3a6   : > { %v1068_v16 = vadd.f32 %v1845_v14, %v1067_v15  ;;  %v1779_v15 = vld [vmem:[%s2257_s28] sm:$0xff] }
 0x3a8   : > { %v1072_v17 = vadd.f32 %v1068_v16, %v2307_v49 }
 0x3aa   : > { %1074 = vadd.xlane.f32.xlu2 %v1072_v17 }
 0x3ad   : > { %v1069_v18 = vpop.f32.mrf.mxu1 }
 0x3ae   : > { %v1070_v19 = vadd.f32 %v1845_v14, %v1069_v18  ;;  %v1780_v14 = vld [vmem:[%s2257_s28 + $0x8] sm:$0xff] }
 0x3af   : > { %1288 = vmatpush.bf16.msra.mxu3 %v1780_v14 }
 0x3b0   : > { %v1073_v20 = vadd.f32 %v1070_v19, %v2312_v50 }
 0x3b2   : > { %1076 = vadd.xlane.f32.xlu2 %v1073_v20 }
 0x3b3   : > { %1289 = vmatpush.bf16.msra.mxu3 %v1779_v15 }
 0x41d   : > { %v1075_v23 = vpop.xlane.xlu2 %1074 }
 0x41e   : > { %v1078_v24 = vmul.f32 0.03125, %v1075_v23 }
 0x420   : > { %v1080_v27 = vsub.f32 %v1072_v17, %v1078_v24  ;;  %v1848_v17 = vld [vmem:[%s654_s0] ss:$0 sm:$0xff] }
 0x421   : > { %v1849_v24 = vld [vmem:[%s657_s20] ss:$0 sm:$0xff] }
 0x422   : > { %v1082_v49 = vmul.f32 %v2364_v26, %v1080_v27 }
 0x424   : > { %v1084_v28 = vmul.f32 %v1082_v49, %v1082_v49 }
 0x425   : > { %v1077_v29 = vpop.xlane.xlu2 %1076 }
 0x426   : > { %v1079_v50 = vmul.f32 0.03125, %v1077_v29  ;;  %1086 = vadd.xlane.f32.xlu0 %v1084_v28 }
 0x428   : > { %v1081_v30 = vsub.f32 %v1073_v20, %v1079_v50 }
 0x42a   : > { %v1083_v31 = vmul.f32 %v2364_v26, %v1081_v30 }
 0x42c   : > { %v1085_v32 = vmul.f32 %v1083_v31, %v1083_v31 }
 0x42e   : > { %1088 = vadd.xlane.f32.xlu1 %v1085_v32 }
 0x499   : > { %v1087_v40 = vpop.xlane.xlu0 %1086 }
 0x49a   : > { %v1090_v42 = vmul.f32 0.03125, %v1087_v40 }
 0x49c   : > { %v1092_v43 = vadd.f32 1e-05, %v1090_v42 }
 0x49e   : > { %1860 = vrsqrt.f32 %v1092_v43  ;;  %vm1100_vm4 = vweird.f32 %v1092_v43 }
 0x4a1   : > { %v1089_v45 = vpop.xlane.xlu1 %1088 }
 0x4a2   : > { %v1091_v46 = vmul.f32 0.03125, %v1089_v45 }
 0x4a4   : > { %v1861_v48 = vpop.eup %1860  ;;  %v1093_v51 = vadd.f32 1e-05, %v1091_v46 }
 0x4a5   : > { %v1095_v52 = vmul.f32 %v1861_v48, %v1092_v43  ;;  %vm1101_vm3 = vweird.f32 %v1861_v48 }
 0x4a6   : > { %1862 = vrsqrt.f32 %v1093_v51  ;;  %vm1102_vm5 = vmor %vm1100_vm4, %vm1101_vm3  ;;  %vm1110_vm7 = vweird.f32 %v1093_v51 }
 0x4a7   : > { %v1096_v55 = vmul.f32 %v1861_v48, %v1095_v52 }
 0x4a9   : > { %v1097_v56 = vmul.f32 0.5, %v1096_v55 }
 0x4ab   : > { %v1098_v58 = vsub.f32 1.5, %v1097_v56  ;;  %v1850_v56 = vld [vmem:[%s660_s30] ss:$0 sm:$0xff] }
 0x4ac   : > { %v1863_v59 = vpop.eup %1862 }
 0x4ad   : > { %v1099_v60 = vmul.f32 %v1861_v48, %v1098_v58  ;;  %v1105_v61 = vmul.f32 %v1863_v59, %v1093_v51  ;;  %vm1111_vm6 = vweird.f32 %v1863_v59 }
 0x4ae   : > { %vm1112_vm8 = vmor %vm1110_vm7, %vm1111_vm6 }
 0x4af   : > { %v1106_v53 = vmul.f32 %v1863_v59, %v1105_v61  ;;  %v1103_v62 = vsel %vm1102_vm5, %v1861_v48, %v1099_v60 }
 0x4b0   : > { %v1114_v1 = vmul.f32 %v1103_v62, %v1082_v49 }
 0x4b1   : > { %v1107_v63 = vmul.f32 0.5, %v1106_v53 }
 0x4b2   : > { %v1120_v6 = vmul.f32 %v1846_v2, %v1114_v1 }
 0x4b3   : > { %v1108_v0 = vsub.f32 1.5, %v1107_v63 }
 0x4b4   : > { %v1126_v9 = vadd.f32 %v1847_v7, %v1120_v6 }
 0x4b5   : > { %v1109_v3 = vmul.f32 %v1863_v59, %v1108_v0 }
 0x4b7   : > { %v1113_v4 = vsel %vm1112_vm8, %v1863_v59, %v1109_v3  ;;  %v1851_v59 = vld [vmem:[%s663_s25] ss:$0 sm:$0xff] }
 0x4b8   : > { %v1115_v5 = vmul.f32 %v1113_v4, %v1083_v31 }
 0x4ba   : > { %v1121_v8 = vmul.f32 %v1846_v2, %v1115_v5 }
 0x4bc   : > { %v1127_v10 = vadd.f32 %v1847_v7, %v1121_v8 }
 0x4be   : > { %v1128_v11 = vpack.c.bf16 %v1127_v10, %v1126_v9 }
 0x4c0   : > { %1205 = vmatmul.bf16.vlgmr.msrb.gmra.mxu2 %v1128_v11 }
 0x543   : > { %v1206_v16 = vpop.f32.mrf.mxu2 }
 0x544   : > { %v1207_v18 = vadd.f32 %v1848_v17, %v1206_v16 }
 0x546   : > { %v1211_v21 = vmax.f32 %v1207_v18, 0.0 }
 0x54b   : > { %v1208_v19 = vpop.f32.mrf.mxu2 }
 0x54c   : > { %v1209_v20 = vadd.f32 %v1848_v17, %v1208_v19 }
 0x54e   : > { %v1212_v22 = vmax.f32 %v1209_v20, 0.0 }
 0x550   : > { %v1213_v23 = vpack.c.bf16 %v1212_v22, %v1211_v21 }
 0x552   : > { %1290 = vmatmul.bf16.vlgmr.msra.gmra.mxu3 %v1213_v23 }
 0x5d5   : > { %v1291_v25 = vpop.f32.mrf.mxu3 }
 0x5d6   : > { %v1292_v27 = vadd.f32 %v1849_v24, %v1291_v25 }
 0x5d8   : > { %v1296_v49 = vadd.f32 %v1292_v27, %v1126_v9 }
 0x5da   : > { %1298 = vadd.xlane.f32.xlu2 %v1296_v49 }
 0x5dd   : > { %v1293_v28 = vpop.f32.mrf.mxu3 }
 0x5de   : > { %v1294_v29 = vadd.f32 %v1849_v24, %v1293_v28 }
 0x5e0   : > { %v1297_v50 = vadd.f32 %v1294_v29, %v1127_v10 }
 0x5e2   : > { %1300 = vadd.xlane.f32.xlu0 %v1297_v50 }
 0x64d   : > { %v1299_v30 = vpop.xlane.xlu2 %1298 }
 0x64e   : > { %v1302_v31 = vmul.f32 0.03125, %v1299_v30 }
 0x650   : > { %v1304_v32 = vsub.f32 %v1296_v49, %v1302_v31 }
 0x652   : > { %v1306_v33 = vmul.f32 %v2364_v26, %v1304_v32 }
 0x654   : > { %v1308_v34 = vmul.f32 %v1306_v33, %v1306_v33 }
 0x655   : > { %v1301_v35 = vpop.xlane.xlu0 %1300 }
 0x656   : > { %v1303_v36 = vmul.f32 0.03125, %v1301_v35  ;;  %1310 = vadd.xlane.f32.xlu1 %v1308_v34 }
 0x658   : > { %v1305_v37 = vsub.f32 %v1297_v50, %v1303_v36 }
 0x65a   : > { %v1307_v38 = vmul.f32 %v2364_v26, %v1305_v37 }
 0x65c   : > { %v1309_v39 = vmul.f32 %v1307_v38, %v1307_v38 }
 0x65e   : > { %1312 = vadd.xlane.f32.xlu2 %v1309_v39 }
 0x6c9   : > { %v1311_v40 = vpop.xlane.xlu1 %1310 }
 0x6ca   : > { %v1314_v41 = vmul.f32 0.03125, %v1311_v40 }
 0x6cc   : > { %v1316_v42 = vadd.f32 1e-05, %v1314_v41 }
 0x6ce   : > { %1864 = vrsqrt.f32 %v1316_v42  ;;  %vm1324_vm10 = vweird.f32 %v1316_v42 }
 0x6d1   : > { %v1313_v43 = vpop.xlane.xlu2 %1312 }
 0x6d2   : > { %v1315_v44 = vmul.f32 0.03125, %v1313_v43 }
 0x6d4   : > { %v1865_v45 = vpop.eup %1864  ;;  %v1317_v46 = vadd.f32 1e-05, %v1315_v44 }
 0x6d5   : > { %v1319_v47 = vmul.f32 %v1865_v45, %v1316_v42  ;;  %vm1325_vm9 = vweird.f32 %v1865_v45 }
 0x6d6   : > { %1866 = vrsqrt.f32 %v1317_v46  ;;  %vm1326_vm11 = vmor %vm1324_vm10, %vm1325_vm9  ;;  %vm1334_vm13 = vweird.f32 %v1317_v46 }
 0x6d7   : > { %v1320_v48 = vmul.f32 %v1865_v45, %v1319_v47 }
 0x6d9   : > { %v1321_v51 = vmul.f32 0.5, %v1320_v48 }
 0x6db   : > { %v1322_v52 = vsub.f32 1.5, %v1321_v51 }
 0x6dc   : > { %v1867_v54 = vpop.eup %1866 }
 0x6dd   : > { %v1323_v26 = vmul.f32 %v1865_v45, %v1322_v52  ;;  %v1329_v55 = vmul.f32 %v1867_v54, %v1317_v46  ;;  %vm1335_vm12 = vweird.f32 %v1867_v54 }
 0x6de   : > { %vm1336_vm14 = vmor %vm1334_vm13, %vm1335_vm12 }
 0x6df   : > { %v1327_v57 = vsel %vm1326_vm11, %v1865_v45, %v1323_v26  ;;  %v1330_v58 = vmul.f32 %v1867_v54, %v1329_v55 }
 0x6e0   : > { %v1338_v60 = vmul.f32 %v1327_v57, %v1306_v33 }
 0x6e1   : > { %v1331_v61 = vmul.f32 0.5, %v1330_v58 }
 0x6e2   : > { %v1344_v53 = vmul.f32 %v1850_v56, %v1338_v60 }
 0x6e3   : > { %v1332_v62 = vsub.f32 1.5, %v1331_v61 }
 0x6e4   : > { %v1350_v63 = vadd.f32 %v1851_v59, %v1344_v53 }
 0x6e5   : > { %v1333_v0 = vmul.f32 %v1867_v54, %v1332_v62 }
 0x6e6   : > { %1352 = vst [vmem:[%s2487_s7] sm:$0xff] %v1350_v63 }
 0x6e7   : > { %v1337_v1 = vsel %vm1336_vm14, %v1867_v54, %v1333_v0 }
 0x6e8   : > { %v1339_v2 = vmul.f32 %v1337_v1, %v1307_v38 }
 0x6ea   : > { %v1345_v3 = vmul.f32 %v1850_v56, %v1339_v2 }
 0x6ec   : > { %v1351_v4 = vadd.f32 %v1851_v59, %v1345_v3 }
 0x6ee   : > { %1353 = vst [vmem:[%s2487_s7 + $0x8] sm:$0xff] %v1351_v4 }
 0x6ef PF: > { %s2493_s28 = sld [smem:[#allocation10_spill]]  ;;  %s2496_s25 = smov %s1988_s26 }
 0x6f0   : > { %s2494_s16 = sld [smem:[#allocation9_spill]] }
 0x6f1   : > { %s2495_s27 = sld [smem:[#allocation11_spill]] }
 0x6f5   : > { %p26_p10 = scmp.ge.s32.totalorder %s2493_s28, 4  }
 0x6f6   : > { %s2497_s26 = smov %s2494_s16 }
 0x6f7   :  { %28 = sbr.rel (!%p26_p10) target bundleno = 16 (0x10), region = 163 }
 0x6fc   :  { %1365 = vsyncpa [#allocation3], 1 }
 0x6fd   :  { %1367 = vsyncpa [#allocation3 + $0x1], 1 }
 0x6fe   :  { %1368 = vsyncpa [#allocation5], 1 }
 0x6ff   :  { %1370 = vsyncpa [#allocation5 + $0x1], 1 }

</bundles_post_ra>
